<compile_context>
chip_gen: v7x
topology: tpu7x:2x2x1
jax: 0.10.0
libtpu: 0.0.40
codegen_flags: <defaults>
</compile_context>

<pallas_src>
import jax
import jax.numpy as jnp
from jax import lax
from jax.experimental import pallas as pl
from jax.experimental.pallas import tpu as pltpu


def _round_up(x, m):
    return (x + m - 1) // m * m


def _make_kernel(K, H, W, Cin, Cout, stride, pad):
    Hp, Wp = H + 2 * pad, W + 2 * pad
    Ho = (H + 2 * pad - K) // stride + 1
    Wo = (W + 2 * pad - K) // stride + 1
    Jw = Ho * Wp  # "wide" flattened output columns (Wp per output row, first Wo are valid)
    # Flat padded-input length so that every tap's (possibly strided) window is in bounds.
    Lneed = max(Hp * Wp, (K - 1) * (Wp + 1) + stride * (Jw - 1) + 1)
    Lflat = _round_up(Lneed, 128)

    def kernel(x_ref, w_ref, b_ref, o_ref, xp_ref):
        # x_ref : (1, Cin, H*W)      unpadded, flattened NCHW input (bf16)
        # w_ref : (Cout, K*K*Cin)    BN-scale-folded weights (bf16)
        # b_ref : (Cout, 1)          folded BN bias (f32)
        # o_ref : (1, Cout, Jw)      wide output (valid columns sliced out in wrapper)
        # xp_ref: (Cin, Lflat)       VMEM scratch: zero-padded, flattened input

        # ---- fused zero padding (no jnp.pad HBM round trip) ----
        xp_ref[...] = jnp.zeros_like(xp_ref)
        x = x_ref[0]                                   # (Cin, H*W)
        for h in range(H):                             # static, unrolled row copies
            dst = (h + pad) * Wp + pad
            xp_ref[:, dst:dst + W] = x[:, h * W:(h + 1) * W]

        # ---- gather the K*K shifted windows; spatial (Ho*Wp) stays on lanes ----
        xp = xp_ref[...]                               # (Cin, Lflat)
        rows = []
        for kh in range(K):
            for kw in range(K):
                base = kh * Wp + kw
                if stride == 1:
                    rows.append(xp[:, base:base + Jw])
                else:
                    # TODO(synk): strided lane slice is untested on-HW for stride > 1.
                    rows.append(xp[:, base:base + stride * Jw:stride])
        patches = jnp.concatenate(rows, axis=0)        # (K*K*Cin, Jw), bf16

        # ---- single contraction-(K*K*Cin) matmul, f32 accumulation ----
        acc = jnp.dot(w_ref[...], patches, preferred_element_type=jnp.float32)  # (Cout, Jw)

        # ---- folded-BN bias + Mish (f32 epilogue, one exp instead of exp/log1p/tanh) ----
        y = acc + b_ref[...]
        t = jnp.exp(jnp.minimum(y, 20.0))
        u2 = (1.0 + t) * (1.0 + t)
        tanh_sp = (u2 - 1.0) / (u2 + 1.0)              # == tanh(softplus(y))
        out = jnp.where(y > 20.0, y, y * tanh_sp)

        o_ref[...] = out.reshape(1, Cout, Jw).astype(o_ref.dtype)

    return kernel, Ho, Wo, Wp, Jw, Lflat


def conv_bn_mish(x_nchw, weight_oihw, gamma, beta, running_mean, running_var,
                 *, stride=1, eps=1e-5, compute_dtype=jnp.bfloat16):
    """Forward of Conv(nn.Conv2d -> nn.BatchNorm2d(eval) -> nn.Mish) on TPU via Pallas."""
    N, Cin, H, W = x_nchw.shape
    Cout, Cin_w, K, K2 = weight_oihw.shape
    assert K == K2
    assert Cin_w == Cin, "groups=1 only"  # TODO(synk): grouped/depthwise conv not implemented
    pad = K // 2

    # Fold BN (eval-mode running stats): scale into weights, keep only a bias for the kernel.
    scale = gamma / jnp.sqrt(running_var + eps)                     # (Cout,)
    bias = (beta - running_mean * scale).astype(jnp.float32)        # (Cout,)
    w_folded = weight_oihw * scale[:, None, None, None]             # (Cout, Cin, K, K)
    # (Cout, K, K, Cin) -> (Cout, K*K*Cin): exact matmul layout, row = (kh*K + kw)*Cin + c.
    w_mat = jnp.transpose(w_folded, (0, 2, 3, 1)).reshape(Cout, K * K * Cin)
    w_mat = w_mat.astype(compute_dtype)

    # NCHW -> (N, Cin, H*W) is a free contiguous reshape (no transpose, no pad in HBM).
    x_flat = x_nchw.reshape(N, Cin, H * W).astype(compute_dtype)

    kernel, Ho, Wo, Wp, Jw, Lflat = _make_kernel(K, H, W, Cin, Cout, stride, pad)

    # TODO(synk): for large feature maps, add an output-row tile grid axis with halo rows
    # (and re-derive the tile for v7x's 64 MiB VMEM); unnecessary at these small shapes.
    out_wide = pl.pallas_call(
        kernel,
        out_shape=jax.ShapeDtypeStruct((N, Cout, Jw), x_nchw.dtype),
        grid_spec=pltpu.PrefetchScalarGridSpec(
            num_scalar_prefetch=0,
            grid=(N,),
            in_specs=[
                pl.BlockSpec((1, Cin, H * W), lambda n: (n, 0, 0)),
                pl.BlockSpec((Cout, K * K * Cin), lambda n: (0, 0)),
                pl.BlockSpec((Cout, 1), lambda n: (0, 0)),
            ],
            out_specs=pl.BlockSpec((1, Cout, Jw), lambda n: (n, 0, 0)),
            scratch_shapes=[pltpu.VMEM((Cin, Lflat), compute_dtype)],
        ),
        compiler_params=pltpu.CompilerParams(
            dimension_semantics=("parallel",),
            vmem_limit_bytes=64 * 1024 * 1024),
    )(x_flat, w_mat, bias.reshape(Cout, 1))

    # (N, Cout, Ho*Wp) -> (N, Cout, Ho, Wp) -> drop the Wp-Wo garbage columns.  Already NCHW.
    return out_wide.reshape(N, Cout, Ho, Wp)[:, :, :, :Wo]


def _reference(x, weight, gamma, beta, running_mean, running_var,
               *, stride=1, eps=1e-5, compute_dtype=jnp.bfloat16):
    """Pure-JAX reference with the same bf16-input / f32-accumulate precision scheme."""
    K = weight.shape[-1]
    pad = K // 2
    scale = gamma / jnp.sqrt(running_var + eps)
    bias = (beta - running_mean * scale).astype(jnp.float32)
    w_folded = (weight * scale[:, None, None, None]).astype(compute_dtype)
    y = lax.conv_general_dilated(
        x.astype(compute_dtype), w_folded,
        window_strides=(stride, stride),
        padding=((pad, pad), (pad, pad)),
        dimension_numbers=("NCHW", "OIHW", "NCHW"),
        preferred_element_type=jnp.float32)
    y = y + bias.reshape(1, -1, 1, 1)
    sp = jnp.where(y > 20.0, y, jnp.log1p(jnp.exp(jnp.minimum(y, 20.0))))
    return (y * jnp.tanh(sp)).astype(x.dtype)


if __name__ == "__main__":
    # Small shapes consistent with Conv(in_channels=4, out_channels=8, kernel_size=3)
    N, Cin, H, W = 2, 4, 16, 16
    Cout, K, stride = 8, 3, 1

    key = jax.random.PRNGKey(0)
    k1, k2, k3, k4, k5, k6 = jax.random.split(key, 6)

    x = jax.random.normal(k1, (N, Cin, H, W), dtype=jnp.float32)
    weight = jax.random.normal(k2, (Cout, Cin, K, K), dtype=jnp.float32) * 0.1
    gamma = 1.0 + 0.1 * jax.random.normal(k3, (Cout,), dtype=jnp.float32)
    beta = 0.1 * jax.random.normal(k4, (Cout,), dtype=jnp.float32)
    running_mean = 0.1 * jax.random.normal(k5, (Cout,), dtype=jnp.float32)
    running_var = jnp.abs(jax.random.normal(k6, (Cout,), dtype=jnp.float32)) + 0.5

    out = conv_bn_mish(x, weight, gamma, beta, running_mean, running_var, stride=stride)
    out = jax.block_until_ready(out)

    ref = _reference(x, weight, gamma, beta, running_mean, running_var, stride=stride)
    assert out.shape == (N, Cout, H, W), out.shape
    err = float(jnp.max(jnp.abs(out - ref)))
    assert jnp.allclose(out, ref, atol=2e-3, rtol=2e-3), f"mismatch vs JAX reference: {err}"

    print("KERNEL_OK")
</pallas_src>

<mosaic_0001>
module attributes {stable_mosaic.version = 11 : i64} {
  func.func @kernel(%arg0: i32, %arg1: memref<1x4x256xbf16, #tpu.memory_space<vmem>>, %arg2: memref<8x36xbf16, #tpu.memory_space<vmem>>, %arg3: memref<8x1xf32, #tpu.memory_space<vmem>>, %arg4: memref<1x8x288xf32, #tpu.memory_space<vmem>>, %arg5: memref<4x384xbf16, #tpu.memory_space<vmem>>) attributes {dimension_semantics = [#tpu.dimension_semantics<parallel>], iteration_bounds = array<i64: 2>, scalar_prefetch = 0 : i64, scratch_operands = 1 : i64, tpu.core_type = #tpu.core_type<tc>, window_params = [{transform_indices = @transform_0, window_bounds = array<i64: 1, 4, 256>}, {pipeline_mode = #tpu.pipeline_mode<synchronous>, transform_indices = @transform_1, window_bounds = array<i64: 8, 36>}, {pipeline_mode = #tpu.pipeline_mode<synchronous>, transform_indices = @transform_2, window_bounds = array<i64: 8, 1>}, {transform_indices = @transform_3, window_bounds = array<i64: 1, 8, 288>}]} {
    %cst = arith.constant 0.000000e+00 : bf16
    %0 = vector.broadcast %cst : bf16 to vector<4x384xbf16>
    %c0 = arith.constant 0 : index
    %c0_0 = arith.constant 0 : index
    %1 = vector.load %arg5[%c0, %c0_0] : memref<4x384xbf16, #tpu.memory_space<vmem>>, vector<4x384xbf16>
    tpu.vector_store %arg5[%c0, %c0_0], %0 {strides = array<i32>} : memref<4x384xbf16, #tpu.memory_space<vmem>>, vector<4x384xbf16>,
    %c0_1 = arith.constant 0 : index
    %c0_2 = arith.constant 0 : index
    %c0_3 = arith.constant 0 : index
    %2 = vector.load %arg1[%c0_1, %c0_2, %c0_3] : memref<1x4x256xbf16, #tpu.memory_space<vmem>>, vector<1x4x256xbf16>
    %3 = vector.shape_cast %2 : vector<1x4x256xbf16> to vector<4x256xbf16>
    %4 = vector.extract_strided_slice %3 {offsets = [0, 0], sizes = [4, 16], strides = [1, 1]} : vector<4x256xbf16> to vector<4x16xbf16>
    %c0_4 = arith.constant 0 : index
    %c19 = arith.constant 19 : index
    %5 = vector.load %arg5[%c0_4, %c19] : memref<4x384xbf16, #tpu.memory_space<vmem>>, vector<4x16xbf16>
    tpu.vector_store %arg5[%c0_4, %c19], %4 {strides = array<i32>} : memref<4x384xbf16, #tpu.memory_space<vmem>>, vector<4x16xbf16>,
    %6 = vector.extract_strided_slice %3 {offsets = [0, 16], sizes = [4, 16], strides = [1, 1]} : vector<4x256xbf16> to vector<4x16xbf16>
    %c0_5 = arith.constant 0 : index
    %c37 = arith.constant 37 : index
    %7 = vector.load %arg5[%c0_5, %c37] : memref<4x384xbf16, #tpu.memory_space<vmem>>, vector<4x16xbf16>
    tpu.vector_store %arg5[%c0_5, %c37], %6 {strides = array<i32>} : memref<4x384xbf16, #tpu.memory_space<vmem>>, vector<4x16xbf16>,
    %8 = vector.extract_strided_slice %3 {offsets = [0, 32], sizes = [4, 16], strides = [1, 1]} : vector<4x256xbf16> to vector<4x16xbf16>
    %c0_6 = arith.constant 0 : index
    %c55 = arith.constant 55 : index
    %9 = vector.load %arg5[%c0_6, %c55] : memref<4x384xbf16, #tpu.memory_space<vmem>>, vector<4x16xbf16>
    tpu.vector_store %arg5[%c0_6, %c55], %8 {strides = array<i32>} : memref<4x384xbf16, #tpu.memory_space<vmem>>, vector<4x16xbf16>,
    %10 = vector.extract_strided_slice %3 {offsets = [0, 48], sizes = [4, 16], strides = [1, 1]} : vector<4x256xbf16> to vector<4x16xbf16>
    %c0_7 = arith.constant 0 : index
    %c73 = arith.constant 73 : index
    %11 = vector.load %arg5[%c0_7, %c73] : memref<4x384xbf16, #tpu.memory_space<vmem>>, vector<4x16xbf16>
    tpu.vector_store %arg5[%c0_7, %c73], %10 {strides = array<i32>} : memref<4x384xbf16, #tpu.memory_space<vmem>>, vector<4x16xbf16>,
    %12 = vector.extract_strided_slice %3 {offsets = [0, 64], sizes = [4, 16], strides = [1, 1]} : vector<4x256xbf16> to vector<4x16xbf16>
    %c0_8 = arith.constant 0 : index
    %c91 = arith.constant 91 : index
    %13 = vector.load %arg5[%c0_8, %c91] : memref<4x384xbf16, #tpu.memory_space<vmem>>, vector<4x16xbf16>
    tpu.vector_store %arg5[%c0_8, %c91], %12 {strides = array<i32>} : memref<4x384xbf16, #tpu.memory_space<vmem>>, vector<4x16xbf16>,
    %14 = vector.extract_strided_slice %3 {offsets = [0, 80], sizes = [4, 16], strides = [1, 1]} : vector<4x256xbf16> to vector<4x16xbf16>
    %c0_9 = arith.constant 0 : index
    %c109 = arith.constant 109 : index
    %15 = vector.load %arg5[%c0_9, %c109] : memref<4x384xbf16, #tpu.memory_space<vmem>>, vector<4x16xbf16>
    tpu.vector_store %arg5[%c0_9, %c109], %14 {strides = array<i32>} : memref<4x384xbf16, #tpu.memory_space<vmem>>, vector<4x16xbf16>,
    %16 = vector.extract_strided_slice %3 {offsets = [0, 96], sizes = [4, 16], strides = [1, 1]} : vector<4x256xbf16> to vector<4x16xbf16>
    %c0_10 = arith.constant 0 : index
    %c127 = arith.constant 127 : index
    %17 = vector.load %arg5[%c0_10, %c127] : memref<4x384xbf16, #tpu.memory_space<vmem>>, vector<4x16xbf16>
    tpu.vector_store %arg5[%c0_10, %c127], %16 {strides = array<i32>} : memref<4x384xbf16, #tpu.memory_space<vmem>>, vector<4x16xbf16>,
    %18 = vector.extract_strided_slice %3 {offsets = [0, 112], sizes = [4, 16], strides = [1, 1]} : vector<4x256xbf16> to vector<4x16xbf16>
    %c0_11 = arith.constant 0 : index
    %c145 = arith.constant 145 : index
    %19 = vector.load %arg5[%c0_11, %c145] : memref<4x384xbf16, #tpu.memory_space<vmem>>, vector<4x16xbf16>
    tpu.vector_store %arg5[%c0_11, %c145], %18 {strides = array<i32>} : memref<4x384xbf16, #tpu.memory_space<vmem>>, vector<4x16xbf16>,
    %20 = vector.extract_strided_slice %3 {offsets = [0, 128], sizes = [4, 16], strides = [1, 1]} : vector<4x256xbf16> to vector<4x16xbf16>
    %c0_12 = arith.constant 0 : index
    %c163 = arith.constant 163 : index
    %21 = vector.load %arg5[%c0_12, %c163] : memref<4x384xbf16, #tpu.memory_space<vmem>>, vector<4x16xbf16>
    tpu.vector_store %arg5[%c0_12, %c163], %20 {strides = array<i32>} : memref<4x384xbf16, #tpu.memory_space<vmem>>, vector<4x16xbf16>,
    %22 = vector.extract_strided_slice %3 {offsets = [0, 144], sizes = [4, 16], strides = [1, 1]} : vector<4x256xbf16> to vector<4x16xbf16>
    %c0_13 = arith.constant 0 : index
    %c181 = arith.constant 181 : index
    %23 = vector.load %arg5[%c0_13, %c181] : memref<4x384xbf16, #tpu.memory_space<vmem>>, vector<4x16xbf16>
    tpu.vector_store %arg5[%c0_13, %c181], %22 {strides = array<i32>} : memref<4x384xbf16, #tpu.memory_space<vmem>>, vector<4x16xbf16>,
    %24 = vector.extract_strided_slice %3 {offsets = [0, 160], sizes = [4, 16], strides = [1, 1]} : vector<4x256xbf16> to vector<4x16xbf16>
    %c0_14 = arith.constant 0 : index
    %c199 = arith.constant 199 : index
    %25 = vector.load %arg5[%c0_14, %c199] : memref<4x384xbf16, #tpu.memory_space<vmem>>, vector<4x16xbf16>
    tpu.vector_store %arg5[%c0_14, %c199], %24 {strides = array<i32>} : memref<4x384xbf16, #tpu.memory_space<vmem>>, vector<4x16xbf16>,
    %26 = vector.extract_strided_slice %3 {offsets = [0, 176], sizes = [4, 16], strides = [1, 1]} : vector<4x256xbf16> to vector<4x16xbf16>
    %c0_15 = arith.constant 0 : index
    %c217 = arith.constant 217 : index
    %27 = vector.load %arg5[%c0_15, %c217] : memref<4x384xbf16, #tpu.memory_space<vmem>>, vector<4x16xbf16>
    tpu.vector_store %arg5[%c0_15, %c217], %26 {strides = array<i32>} : memref<4x384xbf16, #tpu.memory_space<vmem>>, vector<4x16xbf16>,
    %28 = vector.extract_strided_slice %3 {offsets = [0, 192], sizes = [4, 16], strides = [1, 1]} : vector<4x256xbf16> to vector<4x16xbf16>
    %c0_16 = arith.constant 0 : index
    %c235 = arith.constant 235 : index
    %29 = vector.load %arg5[%c0_16, %c235] : memref<4x384xbf16, #tpu.memory_space<vmem>>, vector<4x16xbf16>
    tpu.vector_store %arg5[%c0_16, %c235], %28 {strides = array<i32>} : memref<4x384xbf16, #tpu.memory_space<vmem>>, vector<4x16xbf16>,
    %30 = vector.extract_strided_slice %3 {offsets = [0, 208], sizes = [4, 16], strides = [1, 1]} : vector<4x256xbf16> to vector<4x16xbf16>
    %c0_17 = arith.constant 0 : index
    %c253 = arith.constant 253 : index
    %31 = vector.load %arg5[%c0_17, %c253] : memref<4x384xbf16, #tpu.memory_space<vmem>>, vector<4x16xbf16>
    tpu.vector_store %arg5[%c0_17, %c253], %30 {strides = array<i32>} : memref<4x384xbf16, #tpu.memory_space<vmem>>, vector<4x16xbf16>,
    %32 = vector.extract_strided_slice %3 {offsets = [0, 224], sizes = [4, 16], strides = [1, 1]} : vector<4x256xbf16> to vector<4x16xbf16>
    %c0_18 = arith.constant 0 : index
    %c271 = arith.constant 271 : index
    %33 = vector.load %arg5[%c0_18, %c271] : memref<4x384xbf16, #tpu.memory_space<vmem>>, vector<4x16xbf16>
    tpu.vector_store %arg5[%c0_18, %c271], %32 {strides = array<i32>} : memref<4x384xbf16, #tpu.memory_space<vmem>>, vector<4x16xbf16>,
    %34 = vector.extract_strided_slice %3 {offsets = [0, 240], sizes = [4, 16], strides = [1, 1]} : vector<4x256xbf16> to vector<4x16xbf16>
    %c0_19 = arith.constant 0 : index
    %c289 = arith.constant 289 : index
    %35 = vector.load %arg5[%c0_19, %c289] : memref<4x384xbf16, #tpu.memory_space<vmem>>, vector<4x16xbf16>
    tpu.vector_store %arg5[%c0_19, %c289], %34 {strides = array<i32>} : memref<4x384xbf16, #tpu.memory_space<vmem>>, vector<4x16xbf16>,
    %c0_20 = arith.constant 0 : index
    %c0_21 = arith.constant 0 : index
    %36 = vector.load %arg5[%c0_20, %c0_21] : memref<4x384xbf16, #tpu.memory_space<vmem>>, vector<4x384xbf16>
    %37 = vector.extract_strided_slice %36 {offsets = [0, 0], sizes = [4, 288], strides = [1, 1]} : vector<4x384xbf16> to vector<4x288xbf16>
    %38 = vector.extract_strided_slice %36 {offsets = [0, 1], sizes = [4, 288], strides = [1, 1]} : vector<4x384xbf16> to vector<4x288xbf16>
    %39 = vector.extract_strided_slice %36 {offsets = [0, 2], sizes = [4, 288], strides = [1, 1]} : vector<4x384xbf16> to vector<4x288xbf16>
    %40 = vector.extract_strided_slice %36 {offsets = [0, 18], sizes = [4, 288], strides = [1, 1]} : vector<4x384xbf16> to vector<4x288xbf16>
    %41 = vector.extract_strided_slice %36 {offsets = [0, 19], sizes = [4, 288], strides = [1, 1]} : vector<4x384xbf16> to vector<4x288xbf16>
    %42 = vector.extract_strided_slice %36 {offsets = [0, 20], sizes = [4, 288], strides = [1, 1]} : vector<4x384xbf16> to vector<4x288xbf16>
    %43 = vector.extract_strided_slice %36 {offsets = [0, 36], sizes = [4, 288], strides = [1, 1]} : vector<4x384xbf16> to vector<4x288xbf16>
    %44 = vector.extract_strided_slice %36 {offsets = [0, 37], sizes = [4, 288], strides = [1, 1]} : vector<4x384xbf16> to vector<4x288xbf16>
    %45 = vector.extract_strided_slice %36 {offsets = [0, 38], sizes = [4, 288], strides = [1, 1]} : vector<4x384xbf16> to vector<4x288xbf16>
    %46 = tpu.concatenate %37, %38, %39, %40, %41, %42, %43, %44, %45 in 0 : vector<4x288xbf16>, vector<4x288xbf16>, vector<4x288xbf16>, vector<4x288xbf16>, vector<4x288xbf16>, vector<4x288xbf16>, vector<4x288xbf16>, vector<4x288xbf16>, vector<4x288xbf16> -> vector<36x288xbf16>
    %c0_22 = arith.constant 0 : index
    %c0_23 = arith.constant 0 : index
    %47 = vector.load %arg2[%c0_22, %c0_23] : memref<8x36xbf16, #tpu.memory_space<vmem>>, vector<8x36xbf16>
    %cst_24 = arith.constant dense<0.000000e+00> : vector<8x288xf32>
    %48 = tpu.matmul %47, %46, %cst_24 {dimension_numbers = #tpu.dot_dimension_numbers<[1], [0], [0], [1], [0, 0, 1, 1], [], []>} : vector<8x36xbf16>, vector<36x288xbf16>, vector<8x288xf32> -> vector<8x288xf32>
    %c0_25 = arith.constant 0 : index
    %c0_26 = arith.constant 0 : index
    %49 = vector.load %arg3[%c0_25, %c0_26] : memref<8x1xf32, #tpu.memory_space<vmem>>, vector<8x1xf32>
    %50 = vector.broadcast %49 : vector<8x1xf32> to vector<8x288xf32>
    %51 = arith.addf %48, %50 : vector<8x288xf32>
    %cst_27 = arith.constant 2.000000e+01 : f32
    %52 = vector.broadcast %cst_27 : f32 to vector<8x288xf32>
    %53 = arith.minimumf %51, %52 : vector<8x288xf32>
    %54 = math.exp %53 : vector<8x288xf32>
    %cst_28 = arith.constant 1.000000e+00 : f32
    %55 = vector.broadcast %cst_28 : f32 to vector<8x288xf32>
    %56 = arith.addf %55, %54 : vector<8x288xf32>
    %cst_29 = arith.constant 1.000000e+00 : f32
    %57 = vector.broadcast %cst_29 : f32 to vector<8x288xf32>
    %58 = arith.addf %57, %54 : vector<8x288xf32>
    %59 = arith.mulf %56, %58 : vector<8x288xf32>
    %cst_30 = arith.constant 1.000000e+00 : f32
    %60 = vector.broadcast %cst_30 : f32 to vector<8x288xf32>
    %61 = arith.subf %59, %60 : vector<8x288xf32>
    %cst_31 = arith.constant 1.000000e+00 : f32
    %62 = vector.broadcast %cst_31 : f32 to vector<8x288xf32>
    %63 = arith.addf %59, %62 : vector<8x288xf32>
    %64 = arith.divf %61, %63 : vector<8x288xf32>
    %cst_32 = arith.constant 2.000000e+01 : f32
    %65 = vector.broadcast %cst_32 : f32 to vector<8x288xf32>
    %66 = arith.cmpf ogt, %51, %65 : vector<8x288xf32>
    %67 = arith.mulf %51, %64 : vector<8x288xf32>
    %68 = arith.select %66, %51, %67 : vector<8x288xi1>, vector<8x288xf32>
    %69 = vector.shape_cast %68 : vector<8x288xf32> to vector<1x8x288xf32>
    %c0_33 = arith.constant 0 : index
    %c0_34 = arith.constant 0 : index
    %c0_35 = arith.constant 0 : index
    %70 = vector.load %arg4[%c0_33, %c0_34, %c0_35] : memref<1x8x288xf32, #tpu.memory_space<vmem>>, vector<1x8x288xf32>
    tpu.vector_store %arg4[%c0_33, %c0_34, %c0_35], %69 {strides = array<i32>} : memref<1x8x288xf32, #tpu.memory_space<vmem>>, vector<1x8x288xf32>,
    return
  }
  func.func @transform_0(%arg0: i32) -> (i32, i32, i32) {
    %c0_i32 = arith.constant 0 : i32
    %c0_i32_0 = arith.constant 0 : i32
    %c0_i32_1 = arith.constant 0 : i32
    return %arg0, %c0_i32, %c0_i32_0 : i32, i32, i32
  }
  func.func @transform_1(%arg0: i32) -> (i32, i32) {
    %c0_i32 = arith.constant 0 : i32
    %c0_i32_0 = arith.constant 0 : i32
    %c0_i32_1 = arith.constant 0 : i32
    return %c0_i32, %c0_i32_0 : i32, i32
  }
  func.func @transform_2(%arg0: i32) -> (i32, i32) {
    %c0_i32 = arith.constant 0 : i32
    %c0_i32_0 = arith.constant 0 : i32
    %c0_i32_1 = arith.constant 0 : i32
    return %c0_i32, %c0_i32_0 : i32, i32
  }
  func.func @transform_3(%arg0: i32) -> (i32, i32, i32) {
    %c0_i32 = arith.constant 0 : i32
    %c0_i32_0 = arith.constant 0 : i32
    %c0_i32_1 = arith.constant 0 : i32
    return %arg0, %c0_i32, %c0_i32_0 : i32, i32, i32
  }
}

</mosaic_0001>

<bundles_post_ra>
// kernel: tpu_custom_call.1
= control target key start
LH: loop header
LB: loop body
LE: loop exit
PB: predicated region body
PF: predicated region fallthrough
CT: control target
= control target key end

     0   :  { %8 = vsyncpa [#allocation4], 0  ;;  %s1352_s0 = inlined_call_operand.hbm [shape: bf16[2,4,256], index: 0, kind: input, shape index: {}]   ;;  %s1353_s1 = inlined_call_operand.hbm [shape: bf16[8,36], index: 1, kind: input, shape index: {}]   ;;  %s1354_s2 = inlined_call_operand.hbm [shape: f32[8,1], index: 2, kind: input, shape index: {}]   ;;  %s1355_s3 = inlined_call_operand.hbm [shape: f32[2,8,288], index: 3, kind: output, shape index: {}]  }
   0x1   :  { %10 = vsyncpa [#allocation4 + $0x1], 0 }
   0x2   :  { %11 = vsyncpa [#allocation7], 0 }
   0x3   :  { %12 = vsyncpa [#allocation5], 0 }
   0x4   :  { %14 = vsyncpa [#allocation5 + $0x1], 0  ;;  %s1079_s12 = smov 0   ;;  %s1081_s13 = smov 0  }
   0x5   :  { %s1083_s14 = smov 0   ;;  %s1085_s15 = smov 0  }
   0x6 LB: > { %s1100_s16 = sadd.s32 4294967295, %s1025_s15   ;;  %s721_s17 = sadd.s32 4294967294, %s1025_s15   ;;  %s1025_s15 = sphi %s1085_s15, %s1375_s15   ;;  %s1021_s14 = sphi %s1083_s14, %s1374_s14   ;;  %s1017_s13 = sphi %s1081_s13, %s1373_s13   ;;  %s1013_s12 = sphi %s1079_s12, %s1372_s12  }
   0x7   : > { %p40_p0 = scmp.ne.s32.totalorder %s1017_s13, %s1013_s12  ;;  %p1356_p1 = scmp.eq.s32.totalorder %s1100_s16, 0 }
   0x8   : > { %p112_p3 = scmp.eq.s32.totalorder %s721_s17, 1  ;;  %p722_p5 = scmp.ge.s32.totalorder %s1025_s15, 1 }
   0x9   : > { %p1109_p4 = por %p1356_p1, %p40_p0  ;;  %p119_p7 = scmp.lt.s32.totalorder %s1025_s15, 3 }
   0xa   : > { %p1114_p6 = por %p112_p3, %p40_p0  ;;  %s1027_s21 = smov [#allocation6]  }
   0xb   : > { %s1359_s18 = scalar_select %p1109_p4, 1, 0 }
   0xc   : > { %s1360_s19 = scalar_select %p1114_p6, 1, 0 }
   0xd   : > { %p1119_p8 = pnand %p722_p5, %p119_p7  ;;  %s132_s22 = sshll.u32 %s1027_s21, 4  ;;  %s133_s22 = int_to_ptr.vmem [resolvable:$true] %s132_s22 }
   0xe   : > { %s1028_s23 = smov [#allocation8]   ;;  %s1135_s26 = sadd.s32 1, %s1025_s15  }
   0xf   : > { %s1361_s20 = scalar_select %p1119_p8, 1, 0 }
  0x10   : > { %p771_p10 = pneg %p1119_p8  ;;  %s143_s24 = sshll.u32 %s1028_s23, 4  ;;  %s1132_s24 = int_to_ptr.vmem [resolvable:$true] %s143_s24 }
  0x11   : > { %s24_s27 = ssub.s32 %s1025_s15, %s1135_s26  ;;  %s869_s30 = scalar_lea.hbm %s1353_s1, 64 }
  0x12   : > { %p1128_p11 = pnand %p771_p10, %p1356_p1  ;;  %p870_p12 = scmp.ne.s32.totalorder %s1353_s1, %s869_s30 }
  0x13   : > { %p876_p5 = scmp.lt.u32.totalorder %s869_s30, %s1353_s1 }
  0x14   : > { %p871_p13 = pneg %p1128_p11 }
  0x16   : > { %p872_p0 = pnand %p871_p13, %p870_p12 }
  0x18   : > { %p873_p3 = pneg %p872_p0 }
  0x1a   : > { %p878_p7 = pnand %p876_p5, %p873_p3 }
  0x1c   : > { %881 = shalt.err (!%p878_p7)
}
  0x1d   : > { %s882_s8 = scalar_lea.vmem %s133_s22, 64  ;;  %p890_p2 = scmp.lt.s32.totalorder %s133_s22, %s133_s22 }
  0x1e   : > { %p883_p10 = scmp.ne.s32.totalorder %s133_s22, %s882_s8  ;;  %p891_p6 = scmp.lt.s32.totalorder %s882_s8, %s882_s8 }
  0x20   : > { %p885_p9 = pnand %p883_p10, %p871_p13  ;;  %p892_p4 = por %p891_p6, %p890_p2 }
  0x22   : > { %p886_p1 = pneg %p885_p9 }
  0x24   : > { %p893_p8 = pnand %p892_p4, %p886_p1 }
  0x26   : > { %896 = shalt.err (!%p893_p8)
}
  0x27   : > { %774 = dma.hbm_to_vmem [thread:$0]  (!%p1128_p11), %s1353_s1, 64, %s133_s22, [#allocation7]  }
  0x28   : > { %s897_s21 = scalar_lea.hbm %s1354_s2, 128 }
  0x29   : > { %p898_p9 = scmp.ne.s32.totalorder %s1354_s2, %s897_s21  ;;  %p904_p4 = scmp.lt.u32.totalorder %s897_s21, %s1354_s2 }
  0x2b   : > { %p900_p2 = pnand %p898_p9, %p871_p13 }
  0x2d   : > { %p901_p1 = pneg %p900_p2 }
  0x2f   : > { %p906_p6 = pnand %p904_p4, %p901_p1 }
  0x31   : > { %909 = shalt.err (!%p906_p6)
}
  0x32   : > { %s910_s22 = scalar_lea.vmem %s1132_s24, 128  ;;  %p918_p3 = scmp.lt.s32.totalorder %s1132_s24, %s1132_s24 }
  0x33   : > { %p911_p8 = scmp.ne.s32.totalorder %s1132_s24, %s910_s22  ;;  %p919_p5 = scmp.lt.s32.totalorder %s910_s22, %s910_s22 }
  0x35   : > { %p913_p12 = pnand %p911_p8, %p871_p13  ;;  %p920_p7 = por %p919_p5, %p918_p3 }
  0x37   : > { %p914_p0 = pneg %p913_p12 }
  0x39   : > { %p921_p10 = pnand %p920_p7, %p914_p0 }
  0x3b   : > { %924 = shalt.err (!%p921_p10)
}
  0x3c   : > { %777 = dma.hbm_to_vmem [thread:$0]  (!%p1128_p11), %s1354_s2, 128, %s1132_s24, [#allocation7]  }
  0x3d   : > { %p25_p13 = scmp.eq.s32.totalorder %s24_s27, 0  ;;  %s27_s6 = sadd.s32 1, %s1021_s14 }
  0x3e   : > { %p34_p9 = scmp.ne.s32.totalorder %s1021_s14, %s1017_s13  ;;  %p35_p2 = scmp.eq.s32.totalorder %s1025_s15, 0 }
  0x3f   : > { %s1194_s25 = scalar_select %p25_p13, %s1021_s14, %s27_s6  }
  0x40   : > { %p36_p1 = por %p35_p2, %p34_p9  ;;  %p1363_p4 = scmp.eq.s32.totalorder %s1100_s16, 1 }
  0x41   : > { %p788_p8 = scmp.lt.s32.totalorder %s1025_s15, 2  ;;  %s154_s8 = sand.u32 1, %s1021_s14  }
  0x42   : > { %p1198_p6 = por %p1363_p4, %p34_p9  ;;  %s726_s9 = sshll.u32 %s154_s8, 2 }
  0x43   : > { %s742_s10 = sshll.u32 %s1025_s15, 6  ;;  %s158_s27 = scalar_lea.vmem [#allocation3], %s726_s9 }
  0x44   : > { %s1208_s24 = scalar_lea.hbm %s1352_s0, %s742_s10  ;;  %s166_s21 = sshll.u32 %s158_s27, 4  ;;  %s1210_s21 = int_to_ptr.vmem [resolvable:$true] %s166_s21 }
  0x45   : > { %p1212_p11 = pnand %p788_p8, %p36_p1  ;;  %s155_s28 = scalar_lea.sflag [#allocation4], %s154_s8 }
  0x46   : > { %s925_s29 = scalar_lea.hbm %s1208_s24, 64  ;;  %s930_s4 = scalar_lea.hbm %s1352_s0, 128 }
  0x47   : > { %p926_p12 = scmp.ne.s32.totalorder %s1208_s24, %s925_s29  ;;  %p927_p0 = pneg %p1212_p11 }
  0x48   : > { %p931_p7 = scmp.lt.u32.totalorder %s1208_s24, %s1352_s0  ;;  %p932_p10 = scmp.lt.u32.totalorder %s930_s4, %s925_s29 }
  0x49   : > { %p928_p3 = pnand %p927_p0, %p926_p12  ;;  %p934_p9 = scmp.lt.u32.totalorder %s925_s29, %s1208_s24 }
  0x4a   : > { %p933_p13 = por %p932_p10, %p931_p7 }
  0x4b   : > { %p929_p5 = pneg %p928_p3 }
  0x4c   : > { %p935_p2 = por %p934_p9, %p933_p13 }
  0x4e   : > { %p936_p1 = pnand %p935_p2, %p929_p5 }
  0x50   : > { %939 = shalt.err (!%p936_p1)
}
  0x51   : > { %s940_s8 = scalar_lea.vmem %s1210_s21, 64  ;;  %s1029_s9 = smov [#allocation3]  }
  0x52   : > { %p941_p4 = scmp.ne.s32.totalorder %s1210_s21, %s940_s8  ;;  %s945_s10 = sshll.u32 %s1029_s9, 4  ;;  %s946_s10 = int_to_ptr.vmem [resolvable:$false] %s945_s10 }
  0x53   : > { %s947_s11 = scalar_lea.vmem %s946_s10, 128  ;;  %p948_p3 = scmp.lt.s32.totalorder %s1210_s21, %s946_s10 }
  0x54   : > { %p943_p8 = pnand %p941_p4, %p927_p0  ;;  %p949_p7 = scmp.lt.s32.totalorder %s947_s11, %s940_s8 }
  0x56   : > { %p944_p12 = pneg %p943_p8  ;;  %p950_p10 = por %p949_p7, %p948_p3 }
  0x58   : > { %p951_p13 = pnand %p950_p10, %p944_p12 }
  0x5a   : > { %954 = shalt.err (!%p951_p13)
}
  0x5b   : > { %781 = dma.hbm_to_vmem [thread:$0]  (!%p1212_p11), %s1208_s24, 64, %s1210_s21, %s155_s28  }
  0x5c   : > { %p1366_p5 = scmp.ne.s32.totalorder %s1361_s20, 0 }
  0x5d   : > { %s1244_s17 = sand.u32 (!%p1366_p5), 1, %s1017_s13   ;;  %p1367_p0 = scmp.ne.s32.totalorder (!%p1366_p5), %s1359_s18, 0 }
  0x5e   : > { %175 = sbr.rel (%p1366_p5) target bundleno = 693 (0x2b5), region = 32  ;;  %s730_s27 = sshll.u32 (!%p1366_p5), %s1244_s17, 2 }
  0x5f   : > { %s178_s29 = scalar_lea.sflag (!%p1366_p5), [#allocation4], %s1244_s17  ;;  %s181_s30 = scalar_lea.vmem (!%p1366_p5), [#allocation3], %s730_s27 }
  0x65   : > { %1000 = dma.done.wait (%p1367_p0), %s178_s29, 64  }
  0x66   : > { %1002 = vsyncadd (%p1367_p0), %s178_s29, 4294967232  ;;  %p1368_p9 = scmp.eq.s32.totalorder %s1100_s16, 0 }
  0x68   : > { %1004 = dma.done.wait (%p1368_p9), [#allocation7], 192   ;;  %p1369_p11 = pmov %p1368_p9 }
  0x69   : > { %v1030_v0 = vmov 0   ;;  %v214_v1 = vld [vmem:[%s181_s30] sm:$0xf]  ;;  %s1031_s20 = smov 23   ;;  %s1032_s24 = smov 19   ;;  %vm219_vm0 = vcmask 279704   ;;  %v329_v34 = vlaneseq }
  0x6a   : > { %1006 = vsyncadd (%p1369_p11), [#allocation7], 4294967104  ;;  %213 = vst [vmem:[#allocation2] sm:$0x3f] %v1030_v0  ;;  %528 = vmatprep.mubr.bf16.mxu0 %v1030_v0  ;;  %854 = vset.pattern.permute.xlu0 %v1030_v0  ;;  %s1033_s21 = smov 25   ;;  %s1034_s23 = smov 21  }
  0x6b   : > { %226 = vrot.lane.b32.xlu1 %v214_v1, %s1031_s20  ;;  %216 = vrot.lane.b32.xlu0 %v214_v1, %s1032_s24  ;;  %s1035_s18 = smov 27   ;;  %s1036_s28 = smov 31   ;;  %vm224_vm1 = vcmask 427304   ;;  %vm229_vm2 = vcmask 574904   ;;  %vm234_vm3 = vcmask 722504   ;;  %vm239_vm4 = vcmask 870104  }
  0x6c   : > { %s1037_s22 = smov 35   ;;  %s1038_s4 = smov 29   ;;  %vm252_vm5 = vcmask 1042424   ;;  %vm253_vm6 = vcmask 117762   ;;  %vm249_vm7 = vcmask 252928   ;;  %vm244_vm8 = vcmask 1017704  }
  0x6d   : > { %s1039_s5 = smov 33   ;;  %s1040_s6 = smov 37   ;;  %vm254_vm9 = vmor %vm253_vm6, %vm252_vm5  ;;  %vm264_vm10 = vcmask 285696   ;;  %vm259_vm11 = vcmask 263304   ;;  %vm267_vm12 = vcmask 410904   ;;  %vm272_vm13 = vcmask 302080  }
  0x6e   : > { %s1041_s8 = smov 41   ;;  %s1042_s9 = smov 39   ;;  %vm275_vm14 = vcmask 558504   ;;  %vm288_vm15 = vcmask 334848   ;;  %vm304_vm5 = vcmask 367616   ;;  %vm296_vm6 = vcmask 351232  }
  0x6f   : > { %231 = vrot.lane.b32.xlu1 %v214_v1, %s1033_s21  ;;  %221 = vrot.lane.b32.xlu0 %v214_v1, %s1034_s23  ;;  %s1043_s10 = smov 45   ;;  %s1044_s11 = smov 43   ;;  %v1047_v32 = vmov 1983009808   ;;  %v330_v38 = vshrl.u32 %v329_v34, 7  ;;  %v1054_v47 = vmov 0.0  }
  0x70   : > { %s1045_s27 = smov 47   ;;  %s1046_s29 = smov 49   ;;  %v327_v33 = vunpack.c.l.s4 %v1047_v32  ;;  %747 = vmatprep.subr.bf16.mxu1 %v1054_v47  ;;  %v477_v52 = vld [vmem:[#allocation8] sm:$0xff] }
  0x71   : > { %s1048_s30 = smov 108   ;;  %s1049_s20 = smov 127  }
  0x72   : > { %v328_v37 = vunpack.c.0.s8 %v327_v33  ;;  %s1050_s24 = smov 126   ;;  %s1051_s21 = smov 110  }
  0x73   : > { %236 = vrot.lane.b32.xlu1 %v214_v1, %s1035_s18  ;;  %246 = vrot.lane.b32.xlu0 %v214_v1, %s1036_s28  ;;  %s1052_s23 = smov 109   ;;  %s1053_s18 = smov 92  }
  0x74   : > { %v331_v39 = vsub.s32 %v328_v37, %v330_v38  ;;  %s1055_s28 = smov 91  }
  0x77   : > { %261 = vrot.lane.b32.xlu1 %v214_v1, %s1037_s22  ;;  %241 = vrot.lane.b32.xlu0 %v214_v1, %s1038_s4  ;;  %s1057_s22 = smov 90   ;;  %s757_s4 = smul.u32 24, %s1244_s17 }
  0x7b   : > { %256 = vrot.lane.b32.xlu1 %v214_v1, %s1039_s5  ;;  %269 = vrot.lane.b32.xlu0 %v214_v1, %s1040_s6  ;;  %s758_s5 = smul.u32 384, %s1100_s16  ;;  %s211_s6 = scalar_lea.vmem [#allocation9], %s757_s4 }
  0x7c   : > { %s618_s16 = scalar_lea.sflag [#allocation5], %s1244_s17 }
  0x7f   : > { %285 = vrot.lane.b32.xlu1 %v214_v1, %s1041_s8  ;;  %277 = vrot.lane.b32.xlu0 %v214_v1, %s1042_s9  ;;  %s632_s8 = sshll.u32 %s211_s6, 4  ;;  %s1310_s8 = int_to_ptr.vmem [resolvable:$true] %s632_s8 }
  0x83   : > { %301 = vrot.lane.b32.xlu1 %v214_v1, %s1043_s10  ;;  %293 = vrot.lane.b32.xlu0 %v214_v1, %s1044_s11  ;;  %s1308_s11 = scalar_lea.hbm %s1355_s3, %s758_s5 }
  0x87   : > { %311 = vrot.lane.b32.xlu0 %v214_v1, %s1045_s27  ;;  %317 = vrot.lane.b32.xlu1 %v214_v1, %s1046_s29  ;;  %s955_s27 = scalar_lea.vmem %s1310_s8, 384  ;;  %s1058_s29 = smov [#allocation9]  }
  0x88   : > { %p956_p2 = scmp.ne.s32.totalorder %s1310_s8, %s955_s27 }
  0x8a   : > { %p957_p1 = pnand %p956_p2, %p1198_p6 }
  0x8c   : > { %p958_p4 = pneg %p957_p1 }
  0xdd   : > { %v227_v2 = vpop.permute.xlu1 %226  ;;  %v217_v3 = vpop.permute.xlu0 %216 }
  0xde   : > { %220 = vst.msk [vmem:[#allocation2] sm:$0x3] %vm219_vm0, %v217_v3  ;;  %vm280_vm0 = vcmask 318464  }
  0xe1   : > { %v232_v4 = vpop.permute.xlu1 %231  ;;  %v222_v5 = vpop.permute.xlu0 %221 }
  0xe2   : > { %225 = vst.msk [vmem:[#allocation2] sm:$0x3] %vm224_vm1, %v222_v5  ;;  %vm283_vm1 = vcmask 706104  }
  0xe3   : > { %230 = vst.msk [vmem:[#allocation2] sm:$0x3] %vm229_vm2, %v227_v2  ;;  %vm291_vm2 = vcmask 853704  }
  0xe4   : > { %235 = vst.msk [vmem:[#allocation2] sm:$0x3] %vm234_vm3, %v232_v4  ;;  %vm307_vm3 = vcmask 1042408  }
  0xe5   : > { %v237_v6 = vpop.permute.xlu1 %236  ;;  %v247_v7 = vpop.permute.xlu0 %246 }
  0xe6   : > { %240 = vst.msk [vmem:[#allocation2] sm:$0x3] %vm239_vm4, %v237_v6  ;;  %v248_v8 = vrot.slane %v247_v7, 6  ;;  %vm308_vm4 = vcmask 101378  }
  0xe8   : > { %v250_v11 = vsel %vm249_vm7, %v248_v8, %v247_v7  ;;  %vm299_vm7 = vcmask 1001304  }
  0xe9   : > { %v262_v9 = vpop.permute.xlu1 %261  ;;  %v242_v10 = vpop.permute.xlu0 %241 }
  0xea   : > { %v263_v12 = vrot.slane %v262_v9, 2  ;;  %245 = vst.msk [vmem:[#allocation2] sm:$0x3] %vm244_vm8, %v242_v10  ;;  %vm309_vm8 = vmor %vm308_vm4, %vm307_vm3  ;;  %vm395_vm3 = vcmask 883712   ;;  %vm404_vm4 = vcmask 752640  }
  0xeb   : > { %255 = vst.msk [vmem:[#allocation2] sm:$0xf] %vm254_vm9, %v250_v11  ;;  %vm315_vm9 = vcmask 246904  }
  0xec   : > { %v265_v15 = vsel %vm264_vm10, %v262_v9, %v263_v12  ;;  %vm321_vm10 = vcmask 394504  }
  0xed   : > { %v257_v13 = vpop.permute.xlu1 %256  ;;  %v270_v14 = vpop.permute.xlu0 %269 }
  0xee   : > { %260 = vst.msk [vmem:[#allocation2 + $0x2] sm:$0x3] %vm259_vm11, %v257_v13  ;;  %v271_v16 = vrot.slane %v270_v14, 2  ;;  %vm1056_vm11 = vmmov 0  }
  0xef   : > { %268 = vst.msk [vmem:[#allocation2 + $0x2] sm:$0x3] %vm267_vm12, %v265_v15  ;;  %753 = vmatprep.mubr.msk.bf16.mxu1 %vm1056_vm11, %v1054_v47  ;;  %vm356_vm12 = vcmask 1039360  }
  0xf0   : > { %v273_v17 = vsel %vm272_vm13, %v270_v14, %v271_v16  ;;  %vm425_vm13 = vcmask 1041408  }
  0xf1   : > { %276 = vst.msk [vmem:[#allocation2 + $0x2] sm:$0x3] %vm275_vm14, %v273_v17  ;;  %v286_v18 = vpop.permute.xlu1 %285  ;;  %v278_v19 = vpop.permute.xlu0 %277  ;;  %vm377_vm14 = vcmask 900096  }
  0xf2   : > { %v287_v20 = vrot.slane %v286_v18, 2  ;;  %v279_v21 = vrot.slane %v278_v19, 2 }
  0xf4   : > { %v289_v22 = vsel %vm288_vm15, %v286_v18, %v287_v20  ;;  %v281_v23 = vsel %vm280_vm0, %v278_v19, %v279_v21  ;;  %vm442_vm15 = vcmask 1045504   ;;  %vm367_vm0 = vcmask 1031168  }
  0xf5   : > { %284 = vst.msk [vmem:[#allocation2 + $0x2] sm:$0x3] %vm283_vm1, %v281_v23  ;;  %v302_v24 = vpop.permute.xlu1 %301  ;;  %v294_v25 = vpop.permute.xlu0 %293  ;;  %vm435_vm1 = vcmask 1043456  }
  0xf6   : > { %v303_v26 = vrot.slane %v302_v24, 2  ;;  %292 = vst.msk [vmem:[#allocation2 + $0x2] sm:$0x3] %vm291_vm2, %v289_v22  ;;  %v295_v27 = vrot.slane %v294_v25, 2  ;;  %vm386_vm2 = vcmask 891904  }
  0xf8   : > { %v305_v28 = vsel %vm304_vm5, %v302_v24, %v303_v26  ;;  %v297_v29 = vsel %vm296_vm6, %v294_v25, %v295_v27  ;;  %vm413_vm5 = vcmask 744448   ;;  %vm422_vm6 = vcmask 736256  }
  0xf9   : > { %300 = vst.msk [vmem:[#allocation2 + $0x2] sm:$0x3] %vm299_vm7, %v297_v29  ;;  %v312_v30 = vpop.permute.xlu0 %311  ;;  %v318_v31 = vpop.permute.xlu1 %317  ;;  %vm483_vm7 = vcmask 293888  }
  0xfa   : > { %310 = vst.msk [vmem:[#allocation2 + $0x2] sm:$0xf] %vm309_vm8, %v305_v28  ;;  %v313_v35 = vrot.slane %v312_v30, 2  ;;  %v319_v36 = vrot.slane %v318_v31, 2  ;;  %vm615_vm8 = vcmask 261120  }
  0xfc   : > { %316 = vst.msk [vmem:[#allocation2 + $0x4] sm:$0x3] %vm315_vm9, %v313_v35 }
  0xfd   : > { %322 = vst.msk [vmem:[#allocation2 + $0x4] sm:$0x3] %vm321_vm10, %v319_v36 }
 0x104   : > { %v323_v40 = vld [vmem:[#allocation2] sm:$0x3f] }
 0x105   : > { %v1256_v41 = vrot.slane %v323_v40, %v331_v39  ;;  %v341_v42 = vcombine.low %v323_v40, %v323_v40  ;;  %v325_v44 = vcombine.high %v323_v40, %v323_v40 }
 0x107   : > { %393 = vrot.lane.b32.xlu0 %v1256_v41, %s1048_s30  ;;  %354 = vrot.lane.b32.xlu1 %v1256_v41, %s1049_s20  ;;  %v348_v43 = vrot.slane %v341_v42, %v331_v39  ;;  %v339_v45 = vrot.slane %v325_v44, %v331_v39  ;;  %v359_v46 = vcombine.low %v1256_v41, %v1256_v41 }
 0x108   : > { %v340_v48 = vcombine.high %v1256_v41, %v1256_v41 }
 0x109   : > { %v349_v49 = vcombine.high %v348_v43, %v348_v43  ;;  %v360_v50 = vcombine.low %v339_v45, %v339_v45  ;;  %v370_v51 = vcombine.low %v348_v43, %v348_v43 }
 0x10b   : > { %350 = vrot.lane.b32.xlu0 %v348_v43, %s1049_s20  ;;  %363 = vrot.lane.b32.xlu1 %v1256_v41, %s1050_s24 }
 0x10f   : > { %373 = vrot.lane.b32.xlu0 %v348_v43, %s1051_s21  ;;  %380 = vrot.lane.b32.xlu1 %v1256_v41, %s1052_s23 }
 0x113   : > { %400 = vrot.lane.b32.xlu1 %v1256_v41, %s1053_s18  ;;  %384 = vrot.lane.b32.xlu0 %v339_v45, %s1052_s23 }
 0x117   : > { %361 = vrot.lane.b32.xlu1 %v359_v46, %s1050_s24  ;;  %389 = vrot.lane.b32.xlu0 %v348_v43, %s1048_s30 }
 0x11b   : > { %375 = vrot.lane.b32.xlu1 %v359_v46, %s1051_s21  ;;  %409 = vrot.lane.b32.xlu0 %v348_v43, %s1055_s28 }
 0x11f   : > { %382 = vrot.lane.b32.xlu1 %v340_v48, %s1052_s23  ;;  %352 = vrot.lane.b32.xlu0 %v349_v49, %s1049_s20 }
 0x123   : > { %398 = vrot.lane.b32.xlu1 %v359_v46, %s1053_s18  ;;  %365 = vrot.lane.b32.xlu0 %v360_v50, %s1050_s24 }
 0x127   : > { %411 = vrot.lane.b32.xlu1 %v359_v46, %s1055_s28  ;;  %371 = vrot.lane.b32.xlu0 %v370_v51, %s1051_s21 }
 0x12b   : > { %391 = vrot.lane.b32.xlu1 %v349_v49, %s1048_s30  ;;  %402 = vrot.lane.b32.xlu0 %v360_v50, %s1053_s18  ;;  %v476_v49 = vld [vmem:[#allocation6] sm:$0xf]  ;;  %s959_s30 = sshll.u32 %s1058_s29, 4  ;;  %s960_s30 = int_to_ptr.vmem [resolvable:$false] %s959_s30 }
 0x12c   : > { %s961_s20 = scalar_lea.vmem %s960_s30, 768  ;;  %p962_p8 = scmp.lt.s32.totalorder %s1310_s8, %s960_s30 }
 0x12d   : > { %p963_p12 = scmp.lt.s32.totalorder %s961_s20, %s955_s27 }
 0x12f   : > { %416 = vrot.lane.b32.xlu1 %v1256_v41, %s1057_s22  ;;  %407 = vrot.lane.b32.xlu0 %v370_v51, %s1055_s28  ;;  %p964_p3 = por %p963_p12, %p962_p8 }
 0x131   : > { %p965_p7 = pnand %p964_p3, %p958_p4 }
 0x133   : > { %420 = vrot.lane.b32.xlu1 %v339_v45, %s1057_s22  ;;  %418 = vrot.lane.b32.xlu0 %v340_v48, %s1057_s22 }
 0x137   : > { %480 = vperm.xlu0 %854, %v477_v52  }
 0x179   : > { %v394_v53 = vpop.permute.xlu0 %393  ;;  %v355_v54 = vpop.permute.xlu1 %354 }
 0x17a   : > { %v434_v5 = vsel %vm425_vm13, %v339_v45, %v355_v54 }
 0x17d   : > { %v351_v55 = vpop.permute.xlu0 %350  ;;  %v364_v56 = vpop.permute.xlu1 %363 }
 0x181   : > { %v374_v57 = vpop.permute.xlu0 %373  ;;  %v381_v58 = vpop.permute.xlu1 %380 }
 0x185   : > { %v401_v59 = vpop.permute.xlu1 %400  ;;  %v385_v60 = vpop.permute.xlu0 %384 }
 0x186   : > { %v460_v22 = vsel %vm425_vm13, %v385_v60, %v394_v53 }
 0x189   : > { %v362_v61 = vpop.permute.xlu1 %361  ;;  %v390_v62 = vpop.permute.xlu0 %389 }
 0x18a   : > { %v368_v16 = vsel %vm367_vm0, %v362_v61, %v364_v56 }
 0x18d   : > { %v376_v63 = vpop.permute.xlu1 %375  ;;  %v410_v0 = vpop.permute.xlu0 %409 }
 0x18e   : > { %v379_v11 = vsel %vm377_vm14, %v374_v57, %v376_v63 }
 0x191   : > { %v383_v1 = vpop.permute.xlu1 %382  ;;  %v353_v2 = vpop.permute.xlu0 %352 }
 0x192   : > { %v358_v3 = vsel %vm356_vm12, %v353_v2, %v355_v54  ;;  %v357_v4 = vsel %vm356_vm12, %v351_v55, %v353_v2  ;;  %v387_v23 = vsel %vm386_vm2, %v381_v58, %v383_v1  ;;  %v388_v24 = vsel %vm386_vm2, %v383_v1, %v385_v60 }
 0x193   : > { %v431_v8 = vsel %vm425_vm13, %v340_v48, %v358_v3  ;;  %v428_v12 = vsel %vm425_vm13, %v1256_v41, %v357_v4 }
 0x194   : > { %v437_v20 = vsel %vm435_vm1, %v428_v12, %v368_v16 }
 0x195   : > { %v399_v6 = vpop.permute.xlu1 %398  ;;  %v366_v7 = vpop.permute.xlu0 %365 }
 0x196   : > { %v369_v9 = vsel %vm367_vm0, %v364_v56, %v366_v7  ;;  %v441_v10 = vsel %vm435_vm1, %v434_v5, %v366_v7  ;;  %v405_v36 = vsel %vm404_vm4, %v399_v6, %v401_v59 }
 0x197   : > { %v450_v13 = vsel %vm442_vm15, %v441_v10, %v376_v63  ;;  %v439_v14 = vsel %vm435_vm1, %v431_v8, %v369_v9 }
 0x198   : > { %748 = vmatpush3.bf16.msra.mxu1 %v450_v13  ;;  %v447_v15 = vsel %vm442_vm15, %v439_v14, %v379_v11 }
 0x199   : > { %v412_v17 = vpop.permute.xlu1 %411  ;;  %496 = vmatprep.subr.bf16.mxu0 %v447_v15  ;;  %v372_v18 = vpop.permute.xlu0 %371  ;;  %749 = vmatprep.subr.bf16.mxu1 %v1054_v47 }
 0x19a   : > { %v378_v19 = vsel %vm377_vm14, %v372_v18, %v374_v57  ;;  %v415_v34 = vsel %vm413_vm5, %v410_v0, %v412_v17 }
 0x19b   : > { %v444_v21 = vsel %vm442_vm15, %v437_v20, %v378_v19 }
 0x19c   : > { %497 = vmatpush1.bf16.msra.mxu0 %v444_v21 }
 0x19d   : > { %v392_v25 = vpop.permute.xlu1 %391  ;;  %v403_v26 = vpop.permute.xlu0 %402 }
 0x19e   : > { %v396_v27 = vsel %vm395_vm3, %v390_v62, %v392_v25  ;;  %v397_v28 = vsel %vm395_vm3, %v392_v25, %v394_v53  ;;  %v406_v29 = vsel %vm404_vm4, %v401_v59, %v403_v26  ;;  %v466_v30 = vsel %vm435_vm1, %v460_v22, %v403_v26 }
 0x19f   : > { %v454_v31 = vsel %vm425_vm13, %v387_v23, %v396_v27  ;;  %v457_v32 = vsel %vm425_vm13, %v388_v24, %v397_v28  ;;  %v474_v33 = vsel %vm442_vm15, %v466_v30, %v412_v17 }
 0x1a0   : > { %750 = vmatpush3.bf16.msra.mxu1 %v474_v33  ;;  %v464_v35 = vsel %vm435_vm1, %v457_v32, %v406_v29  ;;  %v462_v41 = vsel %vm435_vm1, %v454_v31, %v405_v36 }
 0x1a1   : > { %v417_v37 = vpop.permute.xlu1 %416  ;;  %v408_v38 = vpop.permute.xlu0 %407  ;;  %v471_v39 = vsel %vm442_vm15, %v464_v35, %v415_v34  ;;  %751 = vmatprep.subr.bf16.mxu1 %v1054_v47 }
 0x1a2   : > { %v414_v40 = vsel %vm413_vm5, %v408_v38, %v410_v0  ;;  %498 = vmatprep.subr.bf16.mxu0 %v471_v39 }
 0x1a3   : > { %v468_v42 = vsel %vm442_vm15, %v462_v41, %v414_v40 }
 0x1a4   : > { %499 = vmatpush1.bf16.msra.mxu0 %v468_v42 }
 0x1a5   : > { %v421_v43 = vpop.permute.xlu1 %420  ;;  %v419_v44 = vpop.permute.xlu0 %418 }
 0x1a6   : > { %v494_v45 = vsel %vm425_vm13, %v421_v43, 0  ;;  %v423_v46 = vsel %vm422_vm6, %v417_v37, %v419_v44  ;;  %v424_v48 = vsel %vm422_vm6, %v419_v44, %v421_v43 }
 0x1a7   : > { %733 = vmatprep.subr.msk.bf16.mxu0 %vm425_vm13, %v424_v48  ;;  %752 = vmatpush3.bf16.msra.mxu1 %v494_v45  ;;  %v488_v47 = vsel %vm425_vm13, %v423_v46, 0 }
 0x1a8   : > { %501 = vmatpush1.bf16.msra.mxu0 %v488_v47 }
 0x1aa   : > { %754 = vmatmul.mubr.msk.bf16.vlgmr.msra.gmra.mrb[0].mxu1 %vm483_vm7, %v476_v49 }
 0x1ab   : > { %734 = vmatmul.mubr.msk.bf16.vlgmr.msra.gmra.mrb[0].mxu0 %vm483_vm7, %v476_v49 }
 0x1b6   : > { %v481_v50 = vpop.permute.xlu0 %480 }
 0x27d   : > { %v571_v51 = vpop.f32.mrb[0].mxu1 }
 0x27e   : > { %v572_v52 = vadd.f32 %v571_v51, %v481_v50  ;;  %v530_v53 = vpop.f32.mrb[0].mxu0  ;;  %v755_v54 = vpop.f32.mrb[1].mxu1 }
 0x27f   : > { %v531_v55 = vadd.f32 %v530_v53, %v481_v50  ;;  %v532_v56 = vpop.f32.mrb[1].mxu0  ;;  %v574_v57 = vpop.f32.mrb[2].mxu1 }
 0x280   : > { %v579_v58 = vmin.f32 %v572_v52, 20.0  ;;  %v533_v59 = vadd.f32 %v532_v56, %v481_v50  ;;  %v534_v60 = vpop.f32.mrb[2].mxu0  ;;  %v756_v61 = vpop.f32.mrb[3].mxu1  ;;  %vm606_vm9 = vcmp.gt.f32.partialorder %v572_v52, 20.0 }
 0x281   : > { %v577_v62 = vmin.f32 %v531_v55, 20.0  ;;  %v535_v63 = vpop.f32.mrb[3].mxu0  ;;  %vm604_vm10 = vcmp.gt.f32.partialorder %v531_v55, 20.0 }
 0x282   : > { %v584_v0 = vmul.f32 1.442695, %v579_v58  ;;  %v578_v1 = vmin.f32 %v533_v59, 20.0  ;;  %vm605_vm11 = vcmp.gt.f32.partialorder %v533_v59, 20.0 }
 0x283   : > { %v580_v2 = vmul.f32 1.442695, %v577_v62 }
 0x284   : > { %857 = vpow2.f32 %v584_v0  ;;  %v582_v3 = vmul.f32 1.442695, %v578_v1 }
 0x285   : > { %859 = vpow2.f32 %v580_v2 }
 0x286   : > { %861 = vpow2.f32 %v582_v3 }
 0x28e   : > { %v858_v4 = vpop.eup %857 }
 0x28f   : > { %v860_v5 = vpop.eup %859  ;;  %v588_v6 = vadd.f32 1.0, %v858_v4 }
 0x290   : > { %v862_v7 = vpop.eup %861  ;;  %v586_v8 = vadd.f32 1.0, %v860_v5 }
 0x291   : > { %v591_v9 = vmul.f32 %v588_v6, %v588_v6  ;;  %v587_v10 = vadd.f32 1.0, %v862_v7 }
 0x292   : > { %v589_v11 = vmul.f32 %v586_v8, %v586_v8 }
 0x293   : > { %v597_v12 = vadd.f32 1.0, %v591_v9  ;;  %v590_v13 = vmul.f32 %v587_v10, %v587_v10  ;;  %v738_v16 = vadd.f32 -1.0, %v591_v9 }
 0x294   : > { %v595_v14 = vadd.f32 1.0, %v589_v11  ;;  %v736_v18 = vadd.f32 -1.0, %v589_v11 }
 0x295   : > { %863 = vrcp.f32 %v597_v12  ;;  %v596_v15 = vadd.f32 1.0, %v590_v13  ;;  %v737_v21 = vadd.f32 -1.0, %v590_v13 }
 0x296   : > { %865 = vrcp.f32 %v595_v14 }
 0x297   : > { %867 = vrcp.f32 %v596_v15 }
 0x29f   : > { %v864_v17 = vpop.eup %863 }
 0x2a0   : > { %v866_v19 = vpop.eup %865  ;;  %v603_v20 = vmul.f32 %v864_v17, %v738_v16 }
 0x2a1   : > { %v868_v22 = vpop.eup %867  ;;  %v599_v23 = vmul.f32 %v866_v19, %v736_v18 }
 0x2a2   : > { %v609_v24 = vmul.f32 %v603_v20, %v572_v52  ;;  %v601_v25 = vmul.f32 %v868_v22, %v737_v21 }
 0x2a3   : > { %v607_v26 = vmul.f32 %v599_v23, %v531_v55 }
 0x2a4   : > { %v612_v27 = vsel %vm606_vm9, %v572_v52, %v609_v24  ;;  %v608_v28 = vmul.f32 %v601_v25, %v533_v59 }
 0x2a5   : > { %v610_v29 = vsel %vm604_vm10, %v531_v55, %v607_v26  ;;  %616 = vst.msk [vmem:[%s211_s6 + $0x10] sm:$0xff] %vm615_vm8, %v612_v27 }
 0x2a6   : > { %613 = vst [vmem:[%s211_s6] sm:$0xff] %v610_v29  ;;  %v611_v30 = vsel %vm605_vm11, %v533_v59, %v608_v28 }
 0x2a7   : > { %614 = vst [vmem:[%s211_s6 + $0x8] sm:$0xff] %v611_v30 }
 0x2a8   : > { %968 = shalt.err (!%p965_p7)
}
 0x2a9   : > { %s969_s17 = scalar_lea.hbm %s1308_s11, 384  ;;  %s973_s23 = scalar_lea.hbm %s1355_s3, 768 }
 0x2aa   : > { %p970_p10 = scmp.ne.s32.totalorder %s1308_s11, %s969_s17  ;;  %p974_p0 = scmp.lt.u32.totalorder %s1308_s11, %s1355_s3 }
 0x2ab   : > { %p975_p9 = scmp.lt.u32.totalorder %s973_s23, %s969_s17  ;;  %p977_p2 = scmp.lt.u32.totalorder %s969_s17, %s1308_s11 }
 0x2ac   : > { %p971_p13 = pnand %p970_p10, %p1198_p6 }
 0x2ad   : > { %p976_p11 = por %p975_p9, %p974_p0 }
 0x2ae   : > { %p972_p5 = pneg %p971_p13 }
 0x2af   : > { %p978_p1 = por %p977_p2, %p976_p11 }
 0x2b1   : > { %p979_p4 = pnand %p978_p1, %p972_p5 }
 0x2b3   : > { %982 = shalt.err (!%p979_p4)
}
 0x2b4   : > { %769 = dma.vmem_to_hbm [thread:$0]  (%p1198_p6), %s1310_s8, 384, %s1308_s11, %s618_s16  }
 0x2b5 PF: > { %s644_s22 = sand.u32 1, %s1013_s12   ;;  %p1370_p8 = scmp.ne.s32.totalorder %s1360_s19, 0 }
 0x2b6   : > { %p1371_p12 = scmp.ge.s32.totalorder %s1025_s15, 2  ;;  %s645_s4 = scalar_lea.sflag [#allocation5], %s644_s22 }
 0x2b8   : > { %p783_p3 = pnand %p1371_p12, %p1370_p8 }
 0x2ba   : > { %1008 = dma.done.wait (!%p783_p3), %s645_s4, 384  }
 0x2bb   : > { %1010 = vsyncadd (!%p783_p3), %s645_s4, 4294966912  ;;  %p17_p7 = scmp.ge.s32.totalorder %s1135_s26, 4   ;;  %s1372_s12 = smov %s1017_s13 }
 0x2bc   : > { %s1373_s13 = smov %s1021_s14  ;;  %s1374_s14 = smov %s1194_s25 }
 0x2bd   : > { %s1375_s15 = smov %s1135_s26  ;;  %19 = sbr.rel (!%p17_p7) target bundleno = 6 (0x6), region = 85 }
 0x2c4   :  { %650 = vsyncpa [#allocation4], 1 }
 0x2c5   :  { %652 = vsyncpa [#allocation4 + $0x1], 1 }
 0x2c6   :  { %653 = vsyncpa [#allocation7], 1 }
 0x2c7   :  { %654 = vsyncpa [#allocation5], 1 }
 0x2c8   :  { %656 = vsyncpa [#allocation5 + $0x1], 1 }

</bundles_post_ra>
